<compile_context>
chip_gen: v7x
topology: tpu7x:2x2x1
jax: 0.10.0
libtpu: 0.0.40
codegen_flags: <defaults>
</compile_context>

<pallas_src>
import functools

import jax
import jax.numpy as jnp
from jax import lax
from jax.experimental import pallas as pl
from jax.experimental.pallas import tpu as pltpu

_EPS = 1e-5  # torch.nn.InstanceNorm2d default (affine=False, no running stats)

# For each output parity (rows or cols), the two contributing taps:
#   (offset into the zero-padded input, kernel index along that axis)
#   even output 2*m   : x_pad[m+1] * w[1]  +  x_pad[m]   * w[3]
#   odd  output 2*m+1 : x_pad[m+2] * w[0]  +  x_pad[m+1] * w[2]
_TAPS = {0: ((1, 1), (0, 3)),
         1: ((2, 0), (1, 2))}


def _pack_weight(weight, cout_p):
    """(Cin, Cout, 4, 4) ConvTranspose2d weight -> (9*Cin, 4*cout_p) matmul RHS.

    Row block widx = 3*ro + co holds window (ro, co); column block p = 2*r + s
    holds output-parity plane (r, s).  Windows that do not feed a plane stay
    zero (the extra MACs are free: the MXU is underfilled at these K/N), and
    channels >= Cout stay zero padding (dropped again in the wrapper).
    """
    cin, cout = weight.shape[0], weight.shape[1]
    w = jnp.zeros((9 * cin, 4 * cout_p), weight.dtype)
    for r in (0, 1):
        for s in (0, 1):
            p = 2 * r + s
            for ro, kh in _TAPS[r]:
                for co, kw in _TAPS[s]:
                    widx = 3 * ro + co
                    w = w.at[widx * cin:(widx + 1) * cin,
                             p * cout_p:p * cout_p + cout].set(weight[:, :, kh, kw])
    return w


def _conv_matmul(get_window, w_ref, Ht, W, Cin):
    """One matmul for a haloed row tile: (Ht*W, 9*Cin) @ (9*Cin, 4*Cout_p)."""
    views = [get_window(ro, co).reshape(Ht * W, Cin)        # 9 windows, sliced once each
             for ro in range(3) for co in range(3)]
    lhs = jnp.concatenate(views, axis=-1)                    # (Ht*W, 9*Cin)
    return jnp.dot(lhs, w_ref[...], preferred_element_type=jnp.float32)


def _fold_planes(v, c):
    """Sum the four parity-plane segments of a (1, 4*c) row -> (1, c)."""
    return v[:, 0:c] + v[:, c:2 * c] + v[:, 2 * c:3 * c] + v[:, 3 * c:4 * c]


def _fused_kernel(x_ref, w_ref, out_ref, *, H, W, Cin, Coutp):
    # x_ref  : (1, H+2, W+2, Cin)   zero-padded NHWC input, one batch element
    # w_ref  : (9*Cin, 4*Coutp)     tap-packed weights
    # out_ref: (1, H*W, 4*Coutp)    normalised + ReLU output (parity-plane layout)
    acc = _conv_matmul(
        lambda ro, co: x_ref[0, pl.ds(ro, H), pl.ds(co, W), :], w_ref, H, W, Cin)
    n_inv = 1.0 / float(4 * H * W)
    mean = _fold_planes(jnp.sum(acc, axis=0, keepdims=True), Coutp) * n_inv
    mean4 = jnp.concatenate([mean] * 4, axis=-1)
    d = acc - mean4
    var = _fold_planes(jnp.sum(d * d, axis=0, keepdims=True), Coutp) * n_inv
    inv4 = jnp.concatenate([lax.rsqrt(var + _EPS)] * 4, axis=-1)
    out_ref[0] = jnp.maximum(d * inv4, 0.0).astype(out_ref.dtype)
    # TODO(synk): nn.Dropout branch (dropout=0.0 default) not implemented.


def _conv_stats_kernel(x_hbm, w_ref, y_ref, st_ref, xbuf, sem, *, Ht, W, Cin, Coutp):
    # x_hbm : (B, H+2, W+2, Cin) left in HBM (pl.ANY); haloed window DMA'd per tile
    # y_ref : (1, Ht*W, 4*Coutp)  unnormalised conv output tile (input dtype)
    # st_ref: (1, 1, 2, 4*Coutp)  per-tile [sum, sum_sq] partials (f32, no carry)
    b = pl.program_id(0)
    t = pl.program_id(1)
    cp = pltpu.make_async_copy(x_hbm.at[b, pl.ds(t * Ht, Ht + 2)], xbuf, sem)
    cp.start()
    cp.wait()
    acc = _conv_matmul(
        lambda ro, co: xbuf[pl.ds(ro, Ht), pl.ds(co, W), :], w_ref, Ht, W, Cin)
    y_ref[0] = acc.astype(y_ref.dtype)
    st_ref[0, 0, 0:1, :] = jnp.sum(acc, axis=0, keepdims=True)
    st_ref[0, 0, 1:2, :] = jnp.sum(acc * acc, axis=0, keepdims=True)


def _norm_relu_kernel(st_ref, y_ref, out_ref, *, Coutp, n_spatial):
    # st_ref: (1, 2, Coutp) reduced stats; y_ref / out_ref: (1, Ht*W, 4*Coutp) aliased
    mean = st_ref[0, 0:1, :] * (1.0 / n_spatial)
    ex2 = st_ref[0, 1:2, :] * (1.0 / n_spatial)
    var = jnp.maximum(ex2 - mean * mean, 0.0)
    inv = lax.rsqrt(var + _EPS)
    mean4 = jnp.concatenate([mean] * 4, axis=-1)
    inv4 = jnp.concatenate([inv] * 4, axis=-1)
    y = y_ref[0].astype(jnp.float32)
    out_ref[0] = jnp.maximum((y - mean4) * inv4, 0.0).astype(out_ref.dtype)


def _vmem_capacity_bytes():
    try:
        return int(pltpu.get_tpu_info().vmem_capacity_bytes)
    except Exception:
        return 64 << 20            # conservative (v7x-sized) fallback


def _working_set_bytes(Ht, W, Cin, Coutp, item):
    y_elems = Ht * W * 4 * Coutp
    x_b = 2 * (Ht + 2) * (W + 2) * Cin * item             # input window / scratch
    w_b = 2 * 9 * Cin * 4 * Coutp * item                  # weight block (double-buffered)
    lhs = 2 * Ht * W * 9 * Cin * item                     # window copies + concat LHS
    p1 = x_b + w_b + lhs + 2 * y_elems * item + y_elems * 4
    p2 = 4 * y_elems * item + y_elems * 4                 # pass-2 in/out blocks + f32 temp
    return max(p1, p2)


def _pick_tile_rows(H, W, Cin, Coutp, item, budget):
    cands = [d for d in range(H, 0, -1)
             if H % d == 0 and (d == H or (d * W) % 8 == 0)]
    for d in cands:
        if _working_set_bytes(d, W, Cin, Coutp, item) <= budget:
            return d
    raise ValueError(
        "UNetUpNOBP pallas kernel: no legal row tile fits the VMEM budget "
        f"(H={H}, W={W}, Cin={Cin}, Cout_padded={Coutp}); W/Cout tiling needed.")


@functools.partial(jax.jit, static_argnames=("tile_rows",))
def unet_up_nobp(x_nchw, skip_nchw, weight, *, tile_rows=None):
    """x: (B, Cin, H, W); skip: (B, Cs, 2H, 2W); weight: (Cin, Cout, 4, 4)."""
    B, Cin, H, W = x_nchw.shape
    Cin_w, Cout, KH, KW = weight.shape
    assert Cin == Cin_w and KH == 4 and KW == 4
    Bs, Cs, H2, W2 = skip_nchw.shape
    assert Bs == B and H2 == 2 * H and W2 == 2 * W

    dtype = x_nchw.dtype
    item = jnp.dtype(dtype).itemsize
    Coutp = -(-Cout // 32) * 32            # 4*Coutp % 128 == 0 -> lane-dense stores

    # Generation-aware VMEM budgeting (v7x: 64 MiB per TC; v5e/v6e: 128 MiB).
    cap = _vmem_capacity_bytes()
    if cap <= (96 << 20):
        tile_budget, vmem_clamp = 20 << 20, 48 << 20
    else:
        tile_budget, vmem_clamp = 44 << 20, 100 << 20

    Ht = (_pick_tile_rows(H, W, Cin, Coutp, item, tile_budget)
          if tile_rows is None else int(tile_rows))
    assert H % Ht == 0 and (Ht == H or (Ht * W) % 8 == 0), (H, W, Ht)
    nT = H // Ht

    vmem_limit = int(min(max(_working_set_bytes(Ht, W, Cin, Coutp, item) + (8 << 20),
                             32 << 20), vmem_clamp))

    # ---- XLA glue: NCHW -> zero-padded NHWC (no overlapping tile stack) ----
    x_pad = jnp.pad(jnp.transpose(x_nchw, (0, 2, 3, 1)),
                    ((0, 0), (1, 1), (1, 1), (0, 0)))        # (B, H+2, W+2, Cin)
    w_big = _pack_weight(weight, Coutp).astype(dtype)         # (9*Cin, 4*Coutp)

    conv_flops = 2 * B * H * W * 9 * Cin * 4 * Coutp
    x_bytes = B * (H + 2) * (W + 2) * Cin * item
    y_bytes = B * H * W * 4 * Coutp * item
    w_bytes = 9 * Cin * 4 * Coutp * item

    if nT == 1:
        # Fused single pass: conv + instance-norm + ReLU epilogue.
        y_norm = pl.pallas_call(
            functools.partial(_fused_kernel, H=H, W=W, Cin=Cin, Coutp=Coutp),
            out_shape=jax.ShapeDtypeStruct((B, H * W, 4 * Coutp), dtype),
            grid=(B,),
            in_specs=[
                pl.BlockSpec((1, H + 2, W + 2, Cin), lambda b: (b, 0, 0, 0)),
                pl.BlockSpec((9 * Cin, 4 * Coutp), lambda b: (0, 0)),
            ],
            out_specs=pl.BlockSpec((1, H * W, 4 * Coutp), lambda b: (b, 0, 0)),
            compiler_params=pltpu.CompilerParams(
                dimension_semantics=("parallel",),
                vmem_limit_bytes=vmem_limit),
            cost_estimate=pl.CostEstimate(
                flops=conv_flops, transcendentals=B * Coutp,
                bytes_accessed=x_bytes + y_bytes + w_bytes),
        )(x_pad, w_big)
    else:
        # Pass 1: conv (manual haloed DMA of the padded input) + per-tile stats.
        y_unnorm, stats = pl.pallas_call(
            functools.partial(_conv_stats_kernel, Ht=Ht, W=W, Cin=Cin, Coutp=Coutp),
            out_shape=(jax.ShapeDtypeStruct((B, H * W, 4 * Coutp), dtype),
                       jax.ShapeDtypeStruct((B, nT, 2, 4 * Coutp), jnp.float32)),
            grid=(B, nT),
            in_specs=[
                pl.BlockSpec(memory_space=pl.ANY),            # padded input stays in HBM
                pl.BlockSpec((9 * Cin, 4 * Coutp), lambda b, t: (0, 0)),
            ],
            out_specs=(
                pl.BlockSpec((1, Ht * W, 4 * Coutp), lambda b, t: (b, t, 0)),
                pl.BlockSpec((1, 1, 2, 4 * Coutp), lambda b, t: (b, t, 0, 0)),
            ),
            scratch_shapes=[
                pltpu.VMEM((Ht + 2, W + 2, Cin), dtype),
                pltpu.SemaphoreType.DMA(()),
            ],
            compiler_params=pltpu.CompilerParams(
                dimension_semantics=("parallel", "parallel"),
                vmem_limit_bytes=vmem_limit),
            cost_estimate=pl.CostEstimate(
                flops=conv_flops, transcendentals=0,
                bytes_accessed=x_bytes + y_bytes + w_bytes),
        )(x_pad, w_big)

        # Tiny cross-tile / cross-plane stats reduction (XLA).
        stats_red = stats.sum(axis=1).reshape(B, 2, 4, Coutp).sum(axis=2)

        # Pass 2: instance-norm + ReLU, in place on the pass-1 buffer.
        y_norm = pl.pallas_call(
            functools.partial(_norm_relu_kernel, Coutp=Coutp,
                              n_spatial=float(4 * H * W)),
            out_shape=jax.ShapeDtypeStruct((B, H * W, 4 * Coutp), dtype),
            grid=(B, nT),
            in_specs=[
                pl.BlockSpec((1, 2, Coutp), lambda b, t: (b, 0, 0)),
                pl.BlockSpec((1, Ht * W, 4 * Coutp), lambda b, t: (b, t, 0)),
            ],
            out_specs=pl.BlockSpec((1, Ht * W, 4 * Coutp), lambda b, t: (b, t, 0)),
            compiler_params=pltpu.CompilerParams(
                dimension_semantics=("parallel", "parallel"),
                vmem_limit_bytes=vmem_limit),
            cost_estimate=pl.CostEstimate(
                flops=3 * B * H * W * 4 * Coutp, transcendentals=B * Coutp,
                bytes_accessed=2 * y_bytes),
            input_output_aliases={1: 0},
        )(stats_red, y_unnorm)

    # ---- XLA glue: parity planes -> interleaved NCHW (one fused transpose) ----
    y = y_norm.reshape(B, H, W, 2, 2, Coutp)                  # (b, m, n, r, s, c)
    y = y.transpose(0, 5, 1, 3, 2, 4).reshape(B, Coutp, 2 * H, 2 * W)[:, :Cout]
    return jnp.concatenate([y, skip_nchw.astype(dtype)], axis=1)


def _reference(x_nchw, skip_nchw, weight):
    """Pure-JAX reference matching PyTorch semantics."""
    w_conv = jnp.flip(weight, (2, 3)).transpose(1, 0, 2, 3)          # OIHW
    y = lax.conv_general_dilated(
        x_nchw, w_conv, window_strides=(1, 1),
        padding=((2, 2), (2, 2)), lhs_dilation=(2, 2),
        dimension_numbers=("NCHW", "OIHW", "NCHW"))
    mean = jnp.mean(y, axis=(2, 3), keepdims=True)
    var = jnp.mean((y - mean) ** 2, axis=(2, 3), keepdims=True)
    y = jnp.maximum((y - mean) / jnp.sqrt(var + _EPS), 0.0)
    return jnp.concatenate([y, skip_nchw], axis=1)


if __name__ == "__main__":
    B, Cin, Cout, H, W = 2, 8, 4, 8, 8       # ConvTranspose doubles spatial dims
    Cs = Cout                                 # typical UNet skip channel count

    key = jax.random.PRNGKey(0)
    kx, ks, kw = jax.random.split(key, 3)
    x = jax.random.normal(kx, (B, Cin, H, W), dtype=jnp.float32)
    skip = jax.random.normal(ks, (B, Cs, 2 * H, 2 * W), dtype=jnp.float32)
    weight = 0.1 * jax.random.normal(kw, (Cin, Cout, 4, 4), dtype=jnp.float32)

    ref = jax.block_until_ready(_reference(x, skip, weight))

    # Default path: nT == 1 -> fused conv + instance-norm + ReLU kernel.
    out = jax.block_until_ready(unet_up_nobp(x, skip, weight))
    assert out.shape == (B, Cout + Cs, 2 * H, 2 * W), out.shape
    assert jnp.allclose(out, ref, atol=2e-4, rtol=2e-4), float(
        jnp.max(jnp.abs(out - ref)))

    # Forced multi-tile: exercises the manual haloed DMA, per-tile stats and
    # the in-place (aliased) norm pass.
    out_t = jax.block_until_ready(unet_up_nobp(x, skip, weight, tile_rows=4))
    assert jnp.allclose(out_t, ref, atol=2e-4, rtol=2e-4), float(
        jnp.max(jnp.abs(out_t - ref)))

    # bf16 smoke test (exercises the reduced-precision intermediate path).
    out_bf = jax.block_until_ready(unet_up_nobp(
        x.astype(jnp.bfloat16), skip.astype(jnp.bfloat16),
        weight.astype(jnp.bfloat16)))
    assert out_bf.dtype == jnp.bfloat16 and out_bf.shape == out.shape
    assert bool(jnp.all(jnp.isfinite(out_bf.astype(jnp.float32))))

    print("KERNEL_OK")
</pallas_src>

<mosaic_0001>
module attributes {stable_mosaic.version = 11 : i64} {
  func.func @_fused_kernel(%arg0: i32, %arg1: memref<1x10x10x8xf32, #tpu.memory_space<vmem>>, %arg2: memref<72x128xf32, #tpu.memory_space<vmem>>, %arg3: memref<1x64x128xf32, #tpu.memory_space<vmem>>) attributes {dimension_semantics = [#tpu.dimension_semantics<parallel>], iteration_bounds = array<i64: 2>, scalar_prefetch = 0 : i64, scratch_operands = 0 : i64, tpu.core_type = #tpu.core_type<tc>, window_params = [{transform_indices = @transform_0, window_bounds = array<i64: 1, 10, 10, 8>}, {pipeline_mode = #tpu.pipeline_mode<synchronous>, transform_indices = @transform_1, window_bounds = array<i64: 72, 128>}, {transform_indices = @transform_2, window_bounds = array<i64: 1, 64, 128>}]} {
    %c0 = arith.constant 0 : index
    %c0_0 = arith.constant 0 : index
    %c0_1 = arith.constant 0 : index
    %c0_2 = arith.constant 0 : index
    %0 = vector.load %arg1[%c0, %c0_0, %c0_1, %c0_2] : memref<1x10x10x8xf32, #tpu.memory_space<vmem>>, vector<1x8x8x8xf32>
    %1 = vector.shape_cast %0 : vector<1x8x8x8xf32> to vector<8x8x8xf32>
    %2 = vector.shape_cast %1 : vector<8x8x8xf32> to vector<64x8xf32>
    %c0_3 = arith.constant 0 : index
    %c0_4 = arith.constant 0 : index
    %c1 = arith.constant 1 : index
    %c0_5 = arith.constant 0 : index
    %3 = vector.load %arg1[%c0_3, %c0_4, %c1, %c0_5] : memref<1x10x10x8xf32, #tpu.memory_space<vmem>>, vector<1x8x8x8xf32>
    %4 = vector.shape_cast %3 : vector<1x8x8x8xf32> to vector<8x8x8xf32>
    %5 = vector.shape_cast %4 : vector<8x8x8xf32> to vector<64x8xf32>
    %c0_6 = arith.constant 0 : index
    %c0_7 = arith.constant 0 : index
    %c2 = arith.constant 2 : index
    %c0_8 = arith.constant 0 : index
    %6 = vector.load %arg1[%c0_6, %c0_7, %c2, %c0_8] : memref<1x10x10x8xf32, #tpu.memory_space<vmem>>, vector<1x8x8x8xf32>
    %7 = vector.shape_cast %6 : vector<1x8x8x8xf32> to vector<8x8x8xf32>
    %8 = vector.shape_cast %7 : vector<8x8x8xf32> to vector<64x8xf32>
    %c0_9 = arith.constant 0 : index
    %c1_10 = arith.constant 1 : index
    %c0_11 = arith.constant 0 : index
    %c0_12 = arith.constant 0 : index
    %9 = vector.load %arg1[%c0_9, %c1_10, %c0_11, %c0_12] : memref<1x10x10x8xf32, #tpu.memory_space<vmem>>, vector<1x8x8x8xf32>
    %10 = vector.shape_cast %9 : vector<1x8x8x8xf32> to vector<8x8x8xf32>
    %11 = vector.shape_cast %10 : vector<8x8x8xf32> to vector<64x8xf32>
    %c0_13 = arith.constant 0 : index
    %c1_14 = arith.constant 1 : index
    %c1_15 = arith.constant 1 : index
    %c0_16 = arith.constant 0 : index
    %12 = vector.load %arg1[%c0_13, %c1_14, %c1_15, %c0_16] : memref<1x10x10x8xf32, #tpu.memory_space<vmem>>, vector<1x8x8x8xf32>
    %13 = vector.shape_cast %12 : vector<1x8x8x8xf32> to vector<8x8x8xf32>
    %14 = vector.shape_cast %13 : vector<8x8x8xf32> to vector<64x8xf32>
    %c0_17 = arith.constant 0 : index
    %c1_18 = arith.constant 1 : index
    %c2_19 = arith.constant 2 : index
    %c0_20 = arith.constant 0 : index
    %15 = vector.load %arg1[%c0_17, %c1_18, %c2_19, %c0_20] : memref<1x10x10x8xf32, #tpu.memory_space<vmem>>, vector<1x8x8x8xf32>
    %16 = vector.shape_cast %15 : vector<1x8x8x8xf32> to vector<8x8x8xf32>
    %17 = vector.shape_cast %16 : vector<8x8x8xf32> to vector<64x8xf32>
    %c0_21 = arith.constant 0 : index
    %c2_22 = arith.constant 2 : index
    %c0_23 = arith.constant 0 : index
    %c0_24 = arith.constant 0 : index
    %18 = vector.load %arg1[%c0_21, %c2_22, %c0_23, %c0_24] : memref<1x10x10x8xf32, #tpu.memory_space<vmem>>, vector<1x8x8x8xf32>
    %19 = vector.shape_cast %18 : vector<1x8x8x8xf32> to vector<8x8x8xf32>
    %20 = vector.shape_cast %19 : vector<8x8x8xf32> to vector<64x8xf32>
    %c0_25 = arith.constant 0 : index
    %c2_26 = arith.constant 2 : index
    %c1_27 = arith.constant 1 : index
    %c0_28 = arith.constant 0 : index
    %21 = vector.load %arg1[%c0_25, %c2_26, %c1_27, %c0_28] : memref<1x10x10x8xf32, #tpu.memory_space<vmem>>, vector<1x8x8x8xf32>
    %22 = vector.shape_cast %21 : vector<1x8x8x8xf32> to vector<8x8x8xf32>
    %23 = vector.shape_cast %22 : vector<8x8x8xf32> to vector<64x8xf32>
    %c0_29 = arith.constant 0 : index
    %c2_30 = arith.constant 2 : index
    %c2_31 = arith.constant 2 : index
    %c0_32 = arith.constant 0 : index
    %24 = vector.load %arg1[%c0_29, %c2_30, %c2_31, %c0_32] : memref<1x10x10x8xf32, #tpu.memory_space<vmem>>, vector<1x8x8x8xf32>
    %25 = vector.shape_cast %24 : vector<1x8x8x8xf32> to vector<8x8x8xf32>
    %26 = vector.shape_cast %25 : vector<8x8x8xf32> to vector<64x8xf32>
    %27 = tpu.concatenate %2, %5, %8, %11, %14, %17, %20, %23, %26 in 1 : vector<64x8xf32>, vector<64x8xf32>, vector<64x8xf32>, vector<64x8xf32>, vector<64x8xf32>, vector<64x8xf32>, vector<64x8xf32>, vector<64x8xf32>, vector<64x8xf32> -> vector<64x72xf32>
    %c0_33 = arith.constant 0 : index
    %c0_34 = arith.constant 0 : index
    %28 = vector.load %arg2[%c0_33, %c0_34] : memref<72x128xf32, #tpu.memory_space<vmem>>, vector<72x128xf32>
    %cst = arith.constant dense<0.000000e+00> : vector<64x128xf32>
    %29 = tpu.matmul %27, %28, %cst {dimension_numbers = #tpu.dot_dimension_numbers<[1], [0], [0], [1], [0, 0, 1, 1], [], []>} : vector<64x72xf32>, vector<72x128xf32>, vector<64x128xf32> -> vector<64x128xf32>
    %cst_35 = arith.constant dense<0.000000e+00> : vector<128xf32>
    %30 = vector.multi_reduction <add>, %29, %cst_35 [0] : vector<64x128xf32> to vector<128xf32>
    %31 = vector.shape_cast %30 : vector<128xf32> to vector<1x128xf32>
    %32 = vector.extract_strided_slice %31 {offsets = [0, 0], sizes = [1, 32], strides = [1, 1]} : vector<1x128xf32> to vector<1x32xf32>
    %33 = vector.extract_strided_slice %31 {offsets = [0, 32], sizes = [1, 32], strides = [1, 1]} : vector<1x128xf32> to vector<1x32xf32>
    %34 = arith.addf %32, %33 : vector<1x32xf32>
    %35 = vector.extract_strided_slice %31 {offsets = [0, 64], sizes = [1, 32], strides = [1, 1]} : vector<1x128xf32> to vector<1x32xf32>
    %36 = arith.addf %34, %35 : vector<1x32xf32>
    %37 = vector.extract_strided_slice %31 {offsets = [0, 96], sizes = [1, 32], strides = [1, 1]} : vector<1x128xf32> to vector<1x32xf32>
    %38 = arith.addf %36, %37 : vector<1x32xf32>
    %cst_36 = arith.constant 3.906250e-03 : f32
    %39 = vector.broadcast %cst_36 : f32 to vector<1x32xf32>
    %40 = arith.mulf %38, %39 : vector<1x32xf32>
    %41 = tpu.concatenate %40, %40, %40, %40 in 1 : vector<1x32xf32>, vector<1x32xf32>, vector<1x32xf32>, vector<1x32xf32> -> vector<1x128xf32>
    %42 = vector.broadcast %41 : vector<1x128xf32> to vector<64x128xf32>
    %43 = arith.subf %29, %42 : vector<64x128xf32>
    %44 = arith.mulf %43, %43 : vector<64x128xf32>
    %cst_37 = arith.constant dense<0.000000e+00> : vector<128xf32>
    %45 = vector.multi_reduction <add>, %44, %cst_37 [0] : vector<64x128xf32> to vector<128xf32>
    %46 = vector.shape_cast %45 : vector<128xf32> to vector<1x128xf32>
    %47 = vector.extract_strided_slice %46 {offsets = [0, 0], sizes = [1, 32], strides = [1, 1]} : vector<1x128xf32> to vector<1x32xf32>
    %48 = vector.extract_strided_slice %46 {offsets = [0, 32], sizes = [1, 32], strides = [1, 1]} : vector<1x128xf32> to vector<1x32xf32>
    %49 = arith.addf %47, %48 : vector<1x32xf32>
    %50 = vector.extract_strided_slice %46 {offsets = [0, 64], sizes = [1, 32], strides = [1, 1]} : vector<1x128xf32> to vector<1x32xf32>
    %51 = arith.addf %49, %50 : vector<1x32xf32>
    %52 = vector.extract_strided_slice %46 {offsets = [0, 96], sizes = [1, 32], strides = [1, 1]} : vector<1x128xf32> to vector<1x32xf32>
    %53 = arith.addf %51, %52 : vector<1x32xf32>
    %cst_38 = arith.constant 3.906250e-03 : f32
    %54 = vector.broadcast %cst_38 : f32 to vector<1x32xf32>
    %55 = arith.mulf %53, %54 : vector<1x32xf32>
    %cst_39 = arith.constant 9.99999974E-6 : f32
    %56 = vector.broadcast %cst_39 : f32 to vector<1x32xf32>
    %57 = arith.addf %55, %56 : vector<1x32xf32>
    %58 = math.rsqrt %57 : vector<1x32xf32>
    %59 = tpu.concatenate %58, %58, %58, %58 in 1 : vector<1x32xf32>, vector<1x32xf32>, vector<1x32xf32>, vector<1x32xf32> -> vector<1x128xf32>
    %60 = vector.broadcast %59 : vector<1x128xf32> to vector<64x128xf32>
    %61 = arith.mulf %43, %60 : vector<64x128xf32>
    %cst_40 = arith.constant 0.000000e+00 : f32
    %62 = vector.broadcast %cst_40 : f32 to vector<64x128xf32>
    %63 = arith.maximumf %61, %62 : vector<64x128xf32>
    %c0_41 = arith.constant 0 : index
    %c0_42 = arith.constant 0 : index
    %c0_43 = arith.constant 0 : index
    %64 = vector.load %arg3[%c0_41, %c0_42, %c0_43] : memref<1x64x128xf32, #tpu.memory_space<vmem>>, vector<1x64x128xf32>
    %65 = vector.shape_cast %64 : vector<1x64x128xf32> to vector<64x128xf32>
    %66 = vector.shape_cast %63 : vector<64x128xf32> to vector<1x64x128xf32>
    tpu.vector_store %arg3[%c0_41, %c0_42, %c0_43], %66 {strides = array<i32>} : memref<1x64x128xf32, #tpu.memory_space<vmem>>, vector<1x64x128xf32>,
    return
  }
  func.func @transform_0(%arg0: i32) -> (i32, i32, i32, i32) {
    %c0_i32 = arith.constant 0 : i32
    %c0_i32_0 = arith.constant 0 : i32
    %c0_i32_1 = arith.constant 0 : i32
    %c0_i32_2 = arith.constant 0 : i32
    return %arg0, %c0_i32, %c0_i32_0, %c0_i32_1 : i32, i32, i32, i32
  }
  func.func @transform_1(%arg0: i32) -> (i32, i32) {
    %c0_i32 = arith.constant 0 : i32
    %c0_i32_0 = arith.constant 0 : i32
    %c0_i32_1 = arith.constant 0 : i32
    return %c0_i32, %c0_i32_0 : i32, i32
  }
  func.func @transform_2(%arg0: i32) -> (i32, i32, i32) {
    %c0_i32 = arith.constant 0 : i32
    %c0_i32_0 = arith.constant 0 : i32
    %c0_i32_1 = arith.constant 0 : i32
    return %arg0, %c0_i32, %c0_i32_0 : i32, i32, i32
  }
}

</mosaic_0001>

<bundles_post_ra>
// kernel: unet_up_nobp.1
= control target key start
LH: loop header
LB: loop body
LE: loop exit
PB: predicated region body
PF: predicated region fallthrough
CT: control target
= control target key end

     0   :  { %s1063_s9 = smov 0   ;;  %s1337_s0 = inlined_call_operand.vmem [shape: f32[2,10,10,8], index: 0, kind: input, shape index: {}]   ;;  %s1338_s1 = inlined_call_operand.vmem [shape: f32[72,128], index: 1, kind: input, shape index: {}]   ;;  %s1339_s2 = inlined_call_operand.vmem [shape: f32[2,64,128], index: 2, kind: output, shape index: {}]  }
   0x1 LB: > { %s871_s10 = sadd.s32 4294967295, %s1037_s9   ;;  %p875_p0 = scmp.ge.s32.totalorder %s1037_s9, 1  ;;  %s1037_s9 = sphi %s1063_s9, %s12_s9  }
   0x2   : > { %p112_p1 = scmp.lt.s32.totalorder %s1037_s9, 3 }
   0x4   : > { %p113_p2 = pnand %p875_p0, %p112_p1 }
   0x5   : > { %p134_p3 = scmp.lt.s32.totalorder (!%p113_p2), %s871_s10, 1  ;;  %s1039_s15 = smov (!%p113_p2), 16   ;;  %v546_v7 = vld [vmem:[%s1338_s1] sm:$0xff] (!%p113_p2)  ;;  %v547_v8 = vld [vmem:[%s1338_s1 + $0x8] sm:$0xff] (!%p113_p2)  ;;  %v548_v12 = vld [vmem:[%s1338_s1 + $0x10] sm:$0xff] (!%p113_p2)  ;;  %vm474_vm0 = vcmask (!%p113_p2), 64512  }
   0x6   : > { %116 = sbr.rel (%p113_p2) target bundleno = 1030 (0x406), region = 28  ;;  %s1040_s16 = smov (!%p113_p2), 8   ;;  %v985_v9 = vpack.c.bf16 (!%p113_p2), %v547_v8, %v546_v7  ;;  %v549_v13 = vld [vmem:[%s1338_s1 + $0x18] sm:$0xff] (!%p113_p2)  ;;  %v550_v15 = vld [vmem:[%s1338_s1 + $0x20] sm:$0xff] (!%p113_p2)  ;;  %v551_v16 = vld [vmem:[%s1338_s1 + $0x28] sm:$0xff] (!%p113_p2)  ;;  %vm483_vm1 = vcmask (!%p113_p2), 130048  }
   0x7   : > { %s1041_s17 = smov (!%p113_p2), 24   ;;  %s1042_s18 = smov (!%p113_p2), 32   ;;  %v989_v14 = vpack.c.bf16 (!%p113_p2), %v549_v13, %v548_v12  ;;  %v993_v17 = vpack.c.bf16 (!%p113_p2), %v551_v16, %v550_v15  ;;  %v552_v20 = vld [vmem:[%s1338_s1 + $0x30] sm:$0xff] (!%p113_p2)  ;;  %v553_v21 = vld [vmem:[%s1338_s1 + $0x38] sm:$0xff] (!%p113_p2)  ;;  %v554_v23 = vld [vmem:[%s1338_s1 + $0x40] sm:$0xff] (!%p113_p2)  ;;  %vm492_vm2 = vcmask (!%p113_p2), 195584  }
   0x8   : > { %s1043_s23 = smov (!%p113_p2), 40   ;;  %986 = vmatprep.subr.bf16.mxu0 (!%p113_p2), %v985_v9  ;;  %1001 = vmatprep.subr.bf16.mxu1 (!%p113_p2), %v985_v9  ;;  %s1044_s4 = smov (!%p113_p2), 48   ;;  %v997_v22 = vpack.c.bf16 (!%p113_p2), %v553_v21, %v552_v20  ;;  %vm501_vm3 = vcmask (!%p113_p2), 261120   ;;  %vm510_vm4 = vcmask (!%p113_p2), 326656   ;;  %vm519_vm5 = vcmask (!%p113_p2), 392192  }
   0x9   : > { %988 = vmatpush3.bf16.msra.mxu0 (!%p113_p2), %v985_v9  ;;  %1006 = vmatpush3.bf16.msra.mxu1 (!%p113_p2), %v985_v9  ;;  %s1045_s13 = smov (!%p113_p2), 56   ;;  %s1046_s19 = smov (!%p113_p2), 64   ;;  %vm528_vm6 = vcmask (!%p113_p2), 457728   ;;  %vm537_vm7 = vcmask (!%p113_p2), 523264   ;;  %vm555_vm8 = vcmask (!%p113_p2), 588800   ;;  %vm724_vm9 = vcmask (!%p113_p2), 785408  }
   0xa   : > { %990 = vmatprep.subr.bf16.mxu0 (!%p113_p2), %v989_v14  ;;  %1002 = vmatprep.subr.bf16.mxu1 (!%p113_p2), %v989_v14 }
   0xd   : > { %s1341_s10 = smov (!%p134_p3, %s871_s10), 1  ;;  %992 = vmatpush3.bf16.msra.mxu0 %v989_v14  ;;  %1007 = vmatpush3.bf16.msra.mxu1 %v989_v14 }
   0xe   : > { %s1011_s11 = smul.u32 160, %s1341_s10  ;;  %994 = vmatprep.subr.bf16.mxu0 %v993_v17  ;;  %1003 = vmatprep.subr.bf16.mxu1 %v993_v17 }
  0x10   : > { %s1077_s14 = scalar_lea.vmem %s1337_s0, %s1011_s11 }
  0x11   : > { %v160_v0 = vld [vmem:[%s1077_s14 + $0x2] sm:$0xff]  ;;  %v161_v2 = vld [vmem:[%s1077_s14 + $0x12] sm:$0xff]  ;;  %996 = vmatpush3.bf16.msra.mxu0 %v993_v17  ;;  %1008 = vmatpush3.bf16.msra.mxu1 %v993_v17 }
  0x12   : > { %v152_v1 = vld [vmem:[%s1077_s14 + $0x1] sm:$0xff]  ;;  %258 = vrot.lane.b32.xlu1 %v160_v0, %s1039_s15  ;;  %v153_v3 = vld [vmem:[%s1077_s14 + $0x11] sm:$0xff]  ;;  %998 = vmatprep.subr.bf16.mxu0 %v997_v22 }
  0x13   : > { %226 = vrot.lane.b32.xlu0 %v152_v1, %s1040_s16  ;;  %v1088_v4 = vld [vmem:[%s1077_s14 + $0x20] sm:$0xff]  ;;  %v1091_v5 = vld [vmem:[%s1077_s14 + $0x10] sm:$0xff]  ;;  %1004 = vmatprep.subr.bf16.mxu1 %v997_v22 }
  0x14   : > { %v154_v6 = vld [vmem:[%s1077_s14 + $0x21] sm:$0xff]  ;;  %v155_v11 = vld [vmem:[%s1077_s14 + $0x31] sm:$0xff] }
  0x15   : > { %v162_v10 = vld [vmem:[%s1077_s14 + $0x22] sm:$0xff]  ;;  %v1128_v18 = vld [vmem:[%s1077_s14 + $0x30] sm:$0xff]  ;;  %1000 = vmatpush3.bf16.msra.mxu0 %v997_v22  ;;  %1009 = vmatpush3.bf16.msra.mxu1 %v997_v22 }
  0x16   : > { %260 = vrot.lane.b32.xlu1 %v161_v2, %s1039_s15  ;;  %v163_v19 = vld [vmem:[%s1077_s14 + $0x32] sm:$0xff]  ;;  %v1147_v24 = vld [vmem:[%s1077_s14 + $0x40] sm:$0xff]  ;;  %971 = vmatprep.subr.mxu0 %v554_v23 }
  0x17   : > { %228 = vrot.lane.b32.xlu0 %v153_v3, %s1040_s16  ;;  %1005 = vmatprep.subr.mxu1 %v554_v23  ;;  %v890_v25 = vld [vmem:[%s1077_s14 + $0x41] sm:$0xff]  ;;  %v157_v27 = vld [vmem:[%s1077_s14 + $0x51] sm:$0xff] }
  0x18   : > { %v164_v26 = vld [vmem:[%s1077_s14 + $0x42] sm:$0xff]  ;;  %v1167_v28 = vld [vmem:[%s1077_s14 + $0x50] sm:$0xff] }
  0x19   : > { %972 = vmatpush3.msra.mxu0 %v554_v23  ;;  %1010 = vmatpush3.msra.mxu1 %v554_v23  ;;  %v165_v29 = vld [vmem:[%s1077_s14 + $0x52] sm:$0xff]  ;;  %v1177_v30 = vld [vmem:[%s1077_s14 + $0x60] sm:$0xff] }
  0x1a   : > { %292 = vrot.lane.b32.xlu1 %v1088_v4, %s1041_s17  ;;  %v892_v31 = vld [vmem:[%s1077_s14 + $0x61] sm:$0xff]  ;;  %v159_v33 = vld [vmem:[%s1077_s14 + $0x71] sm:$0xff] }
  0x1b   : > { %290 = vrot.lane.b32.xlu0 %v1091_v5, %s1041_s17  ;;  %v166_v32 = vld [vmem:[%s1077_s14 + $0x62] sm:$0xff]  ;;  %v1197_v34 = vld [vmem:[%s1077_s14 + $0x70] sm:$0xff] }
  0x1c   : > { %v167_v35 = vld [vmem:[%s1077_s14 + $0x72] sm:$0xff]  ;;  %v886_v36 = vld [vmem:[%s1077_s14 + $0x80] sm:$0xff] }
  0x1d   : > { %v894_v37 = vld [vmem:[%s1077_s14 + $0x81] sm:$0xff]  ;;  %v910_v39 = vld [vmem:[%s1077_s14 + $0x90] sm:$0xff] }
  0x1e   : > { %230 = vrot.lane.b32.xlu1 %v154_v6, %s1040_s16  ;;  %v902_v38 = vld [vmem:[%s1077_s14 + $0x82] sm:$0xff]  ;;  %v918_v42 = vld [vmem:[%s1077_s14 + $0x91] sm:$0xff] }
  0x1f   : > { %322 = vrot.lane.b32.xlu0 %v153_v3, %s1042_s18  ;;  %v926_v45 = vld [vmem:[%s1077_s14 + $0x92] sm:$0xff]  ;;  %v144_v58 = vld [vmem:[%s1077_s14] sm:$0xff]  ;;  %s1047_s14 = smov 96  }
  0x22   : > { %354 = vrot.lane.b32.xlu1 %v161_v2, %s1043_s23 }
  0x23   : > { %324 = vrot.lane.b32.xlu0 %v154_v6, %s1042_s18 }
  0x26   : > { %262 = vrot.lane.b32.xlu1 %v162_v10, %s1039_s15 }
  0x27   : > { %232 = vrot.lane.b32.xlu0 %v155_v11, %s1040_s16 }
  0x2a   : > { %386 = vrot.lane.b32.xlu1 %v1088_v4, %s1044_s4 }
  0x2b   : > { %356 = vrot.lane.b32.xlu0 %v162_v10, %s1043_s23 }
  0x2e   : > { %294 = vrot.lane.b32.xlu1 %v1128_v18, %s1041_s17 }
  0x2f   : > { %264 = vrot.lane.b32.xlu0 %v163_v19, %s1039_s15 }
  0x32   : > { %418 = vrot.lane.b32.xlu1 %v154_v6, %s1045_s13 }
  0x33   : > { %388 = vrot.lane.b32.xlu0 %v1128_v18, %s1044_s4 }
  0x36   : > { %326 = vrot.lane.b32.xlu1 %v155_v11, %s1042_s18 }
  0x37   : > { %296 = vrot.lane.b32.xlu0 %v1147_v24, %s1041_s17 }
  0x3a   : > { %450 = vrot.lane.b32.xlu1 %v162_v10, %s1046_s19 }
  0x3b   : > { %420 = vrot.lane.b32.xlu0 %v155_v11, %s1045_s13 }
  0x3e   : > { %328 = vrot.lane.b32.xlu1 %v890_v25, %s1042_s18 }
  0x3f   : > { %234 = vrot.lane.b32.xlu0 %v890_v25, %s1040_s16 }
  0x42   : > { %452 = vrot.lane.b32.xlu1 %v163_v19, %s1046_s19 }
  0x43   : > { %358 = vrot.lane.b32.xlu0 %v163_v19, %s1043_s23 }
  0x46   : > { %266 = vrot.lane.b32.xlu1 %v164_v26, %s1039_s15 }
  0x47   : > { %236 = vrot.lane.b32.xlu0 %v157_v27, %s1040_s16 }
  0x4a   : > { %390 = vrot.lane.b32.xlu1 %v1147_v24, %s1044_s4 }
  0x4b   : > { %360 = vrot.lane.b32.xlu0 %v164_v26, %s1043_s23 }
  0x4e   : > { %298 = vrot.lane.b32.xlu1 %v1167_v28, %s1041_s17 }
  0x4f   : > { %268 = vrot.lane.b32.xlu0 %v165_v29, %s1039_s15 }
  0x52   : > { %422 = vrot.lane.b32.xlu1 %v890_v25, %s1045_s13 }
  0x53   : > { %392 = vrot.lane.b32.xlu0 %v1167_v28, %s1044_s4 }
  0x56   : > { %330 = vrot.lane.b32.xlu1 %v157_v27, %s1042_s18 }
  0x57   : > { %300 = vrot.lane.b32.xlu0 %v1177_v30, %s1041_s17 }
  0x5a   : > { %454 = vrot.lane.b32.xlu1 %v164_v26, %s1046_s19 }
  0x5b   : > { %424 = vrot.lane.b32.xlu0 %v157_v27, %s1045_s13 }
  0x5e   : > { %332 = vrot.lane.b32.xlu1 %v892_v31, %s1042_s18 }
  0x5f   : > { %238 = vrot.lane.b32.xlu0 %v892_v31, %s1040_s16 }
  0x62   : > { %456 = vrot.lane.b32.xlu1 %v165_v29, %s1046_s19 }
  0x63   : > { %362 = vrot.lane.b32.xlu0 %v165_v29, %s1043_s23 }
  0x66   : > { %270 = vrot.lane.b32.xlu1 %v166_v32, %s1039_s15 }
  0x67   : > { %240 = vrot.lane.b32.xlu0 %v159_v33, %s1040_s16 }
  0x6a   : > { %394 = vrot.lane.b32.xlu1 %v1177_v30, %s1044_s4 }
  0x6b   : > { %364 = vrot.lane.b32.xlu0 %v166_v32, %s1043_s23 }
  0x6e   : > { %302 = vrot.lane.b32.xlu1 %v1197_v34, %s1041_s17 }
  0x6f   : > { %272 = vrot.lane.b32.xlu0 %v167_v35, %s1039_s15  ;;  %s937_s15 = sshll.u32 %s1341_s10, 6 }
  0x72   : > { %426 = vrot.lane.b32.xlu1 %v892_v31, %s1045_s13 }
  0x73   : > { %396 = vrot.lane.b32.xlu0 %v1197_v34, %s1044_s4 }
  0x76   : > { %334 = vrot.lane.b32.xlu1 %v159_v33, %s1042_s18 }
  0x77   : > { %304 = vrot.lane.b32.xlu0 %v886_v36, %s1041_s17 }
  0x7a   : > { %458 = vrot.lane.b32.xlu1 %v166_v32, %s1046_s19 }
  0x7b   : > { %428 = vrot.lane.b32.xlu0 %v159_v33, %s1045_s13 }
  0x7e   : > { %366 = vrot.lane.b32.xlu1 %v167_v35, %s1043_s23 }
  0x7f   : > { %336 = vrot.lane.b32.xlu0 %v894_v37, %s1042_s18 }
  0x82   : > { %368 = vrot.lane.b32.xlu1 %v902_v38, %s1043_s23 }
  0x83   : > { %460 = vrot.lane.b32.xlu0 %v167_v35, %s1046_s19 }
  0x84   : > { %v259_v40 = vpop.permute.xlu1 %258 }
  0x85   : > { %v227_v41 = vpop.permute.xlu0 %226 }
  0x86   : > { %400 = vrot.lane.b32.xlu1 %v910_v39, %s1044_s4  ;;  %v475_v59 = vsel %vm474_vm0, %v144_v58, %v227_v41 }
  0x87   : > { %398 = vrot.lane.b32.xlu0 %v886_v36, %s1044_s4  ;;  %v484_v62 = vsel %vm483_vm1, %v475_v59, %v259_v40 }
  0x88   : > { %v261_v43 = vpop.permute.xlu1 %260 }
  0x89   : > { %v229_v44 = vpop.permute.xlu0 %228 }
  0x8a   : > { %432 = vrot.lane.b32.xlu1 %v918_v42, %s1045_s13  ;;  %v476_v7 = vsel %vm474_vm0, %v1091_v5, %v229_v44 }
  0x8b   : > { %430 = vrot.lane.b32.xlu0 %v894_v37, %s1045_s13  ;;  %v485_v12 = vsel %vm483_vm1, %v476_v7, %v261_v43 }
  0x8c   : > { %v293_v46 = vpop.permute.xlu1 %292 }
  0x8d   : > { %v291_v47 = vpop.permute.xlu0 %290  ;;  %v494_v13 = vsel %vm492_vm2, %v485_v12, %v293_v46 }
  0x8e   : > { %464 = vrot.lane.b32.xlu1 %v926_v45, %s1046_s19  ;;  %v493_v63 = vsel %vm492_vm2, %v484_v62, %v291_v47 }
  0x8f   : > { %462 = vrot.lane.b32.xlu0 %v902_v38, %s1046_s19 }
  0x90   : > { %v231_v48 = vpop.permute.xlu1 %230 }
  0x91   : > { %v323_v49 = vpop.permute.xlu0 %322  ;;  %v477_v35 = vsel %vm474_vm0, %v1088_v4, %v231_v48 }
  0x92   : > { %v502_v2 = vsel %vm501_vm3, %v493_v63, %v323_v49 }
  0x94   : > { %v355_v50 = vpop.permute.xlu1 %354 }
  0x95   : > { %v325_v51 = vpop.permute.xlu0 %324  ;;  %v511_v3 = vsel %vm510_vm4, %v502_v2, %v355_v50 }
  0x96   : > { %v503_v16 = vsel %vm501_vm3, %v494_v13, %v325_v51 }
  0x98   : > { %v263_v52 = vpop.permute.xlu1 %262 }
  0x99   : > { %v1226_v53 = vpop.permute.xlu0 %232  ;;  %v486_v36 = vsel %vm483_vm1, %v477_v35, %v263_v52 }
  0x9a   : > { %v478_v4 = vsel %vm474_vm0, %v1128_v18, %v1226_v53 }
  0x9c   : > { %v387_v54 = vpop.permute.xlu1 %386 }
  0x9d   : > { %v357_v55 = vpop.permute.xlu0 %356  ;;  %v520_v6 = vsel %vm519_vm5, %v511_v3, %v387_v54 }
  0x9e   : > { %v512_v17 = vsel %vm510_vm4, %v503_v16, %v357_v55 }
  0xa0   : > { %v295_v56 = vpop.permute.xlu1 %294 }
  0xa1   : > { %v265_v57 = vpop.permute.xlu0 %264  ;;  %v495_v37 = vsel %vm492_vm2, %v486_v36, %v295_v56 }
  0xa2   : > { %v487_v47 = vsel %vm483_vm1, %v478_v4, %v265_v57 }
  0xa4   : > { %v419_v60 = vpop.permute.xlu1 %418 }
  0xa5   : > { %v389_v61 = vpop.permute.xlu0 %388  ;;  %v529_v8 = vsel %vm528_vm6, %v520_v6, %v419_v60 }
  0xa6   : > { %v521_v5 = vsel %vm519_vm5, %v512_v17, %v389_v61 }
  0xa8   : > { %v327_v0 = vpop.permute.xlu1 %326 }
  0xa9   : > { %v297_v1 = vpop.permute.xlu0 %296  ;;  %v504_v40 = vsel %vm501_vm3, %v495_v37, %v327_v0 }
  0xaa   : > { %v496_v48 = vsel %vm492_vm2, %v487_v47, %v297_v1 }
  0xac   : > { %v451_v9 = vpop.permute.xlu1 %450 }
  0xad   : > { %v421_v10 = vpop.permute.xlu0 %420  ;;  %v538_v11 = vsel %vm537_vm7, %v529_v8, %v451_v9 }
  0xae   : > { %973 = vmatprep.mubr.msk.f32.mxu0 %vm555_vm8, %v538_v11  ;;  %v530_v19 = vsel %vm528_vm6, %v521_v5, %v421_v10 }
  0xb0   : > { %v329_v14 = vpop.permute.xlu1 %328 }
  0xb1   : > { %v235_v15 = vpop.permute.xlu0 %234  ;;  %v505_v51 = vsel %vm501_vm3, %v496_v48, %v329_v14 }
  0xb2   : > { %v479_v1 = vsel %vm474_vm0, %v1147_v24, %v235_v15 }
  0xb4   : > { %v453_v20 = vpop.permute.xlu1 %452 }
  0xb5   : > { %v359_v21 = vpop.permute.xlu0 %358  ;;  %v539_v22 = vsel %vm537_vm7, %v530_v19, %v453_v20 }
  0xb6   : > { %974 = vmatmul.mubr.msk.f32.vlgmr.msra.gmra.mrb[0].mxu0 %vm555_vm8, %v539_v22  ;;  %v513_v41 = vsel %vm510_vm4, %v504_v40, %v359_v21 }
  0xb8   : > { %v267_v23 = vpop.permute.xlu1 %266 }
  0xb9   : > { %v237_v25 = vpop.permute.xlu0 %236  ;;  %v488_v2 = vsel %vm483_vm1, %v479_v1, %v267_v23 }
  0xba   : > { %v480_v24 = vsel %vm474_vm0, %v1167_v28, %v237_v25 }
  0xbc   : > { %v391_v26 = vpop.permute.xlu1 %390 }
  0xbd   : > { %v361_v27 = vpop.permute.xlu0 %360  ;;  %v522_v42 = vsel %vm519_vm5, %v513_v41, %v391_v26 }
  0xbe   : > { %v514_v52 = vsel %vm510_vm4, %v505_v51, %v361_v27 }
  0xc0   : > { %v299_v29 = vpop.permute.xlu1 %298 }
  0xc1   : > { %v269_v31 = vpop.permute.xlu0 %268  ;;  %v497_v3 = vsel %vm492_vm2, %v488_v2, %v299_v29 }
  0xc2   : > { %v489_v15 = vsel %vm483_vm1, %v480_v24, %v269_v31 }
  0xc4   : > { %v423_v32 = vpop.permute.xlu1 %422 }
  0xc5   : > { %v393_v33 = vpop.permute.xlu0 %392  ;;  %v531_v43 = vsel %vm528_vm6, %v522_v42, %v423_v32 }
  0xc6   : > { %v523_v54 = vsel %vm519_vm5, %v514_v52, %v393_v33 }
  0xc8   : > { %v331_v38 = vpop.permute.xlu1 %330 }
  0xc9   : > { %v301_v39 = vpop.permute.xlu0 %300  ;;  %v506_v8 = vsel %vm501_vm3, %v497_v3, %v331_v38 }
  0xca   : > { %v498_v16 = vsel %vm492_vm2, %v489_v15, %v301_v39 }
  0xcc   : > { %v455_v44 = vpop.permute.xlu1 %454 }
  0xcd   : > { %v425_v45 = vpop.permute.xlu0 %424  ;;  %v540_v46 = vsel %vm537_vm7, %v531_v43, %v455_v44 }
  0xce   : > { %976 = vmatprep.mubr.msk.f32.mxu0 %vm555_vm8, %v540_v46  ;;  %v532_v55 = vsel %vm528_vm6, %v523_v54, %v425_v45 }
  0xd0   : > { %v333_v49 = vpop.permute.xlu1 %332 }
  0xd1   : > { %v239_v50 = vpop.permute.xlu0 %238  ;;  %v507_v19 = vsel %vm501_vm3, %v498_v16, %v333_v49 }
  0xd2   : > { %v481_v29 = vsel %vm474_vm0, %v1177_v30, %v239_v50 }
  0xd4   : > { %v457_v56 = vpop.permute.xlu1 %456 }
  0xd5   : > { %v363_v58 = vpop.permute.xlu0 %362  ;;  %v541_v18 = vsel %vm537_vm7, %v532_v55, %v457_v56 }
  0xd6   : > { %977 = vmatmul.mubr.msk.f32.gmra.mrb[2].mxu0 %vm555_vm8, %v541_v18  ;;  %v515_v9 = vsel %vm510_vm4, %v506_v8, %v363_v58 }
  0xd8   : > { %v271_v53 = vpop.permute.xlu1 %270 }
  0xd9   : > { %v241_v57 = vpop.permute.xlu0 %240  ;;  %v490_v32 = vsel %vm483_vm1, %v481_v29, %v271_v53 }
  0xda   : > { %v482_v31 = vsel %vm474_vm0, %v1197_v34, %v241_v57 }
  0xdc   : > { %v395_v59 = vpop.permute.xlu1 %394 }
  0xdd   : > { %v365_v60 = vpop.permute.xlu0 %364  ;;  %v524_v10 = vsel %vm519_vm5, %v515_v9, %v395_v59 }
  0xde   : > { %v516_v20 = vsel %vm510_vm4, %v507_v19, %v365_v60 }
  0xe0   : > { %v303_v61 = vpop.permute.xlu1 %302 }
  0xe1   : > { %v273_v62 = vpop.permute.xlu0 %272  ;;  %v499_v35 = vsel %vm492_vm2, %v490_v32, %v303_v61 }
  0xe2   : > { %v491_v33 = vsel %vm483_vm1, %v482_v31, %v273_v62 }
  0xe4   : > { %v427_v63 = vpop.permute.xlu1 %426 }
  0xe5   : > { %v397_v0 = vpop.permute.xlu0 %396  ;;  %v533_v11 = vsel %vm528_vm6, %v524_v10, %v427_v63 }
  0xe6   : > { %v525_v21 = vsel %vm519_vm5, %v516_v20, %v397_v0 }
  0xe8   : > { %v335_v6 = vpop.permute.xlu1 %334 }
  0xe9   : > { %v305_v7 = vpop.permute.xlu0 %304  ;;  %v508_v39 = vsel %vm501_vm3, %v499_v35, %v335_v6 }
  0xea   : > { %v500_v36 = vsel %vm492_vm2, %v491_v33, %v305_v7 }
  0xec   : > { %v459_v12 = vpop.permute.xlu1 %458 }
  0xed   : > { %v429_v13 = vpop.permute.xlu0 %428  ;;  %v542_v14 = vsel %vm537_vm7, %v533_v11, %v459_v12 }
  0xee   : > { %979 = vmatprep.mubr.msk.f32.mxu1 %vm555_vm8, %v542_v14  ;;  %v534_v22 = vsel %vm528_vm6, %v525_v21, %v429_v13  ;;  %v726_v13 = vlaneseq }
  0xf0   : > { %v367_v17 = vpop.permute.xlu1 %366  ;;  %v1315_v14 = vshrl.u32 %v726_v13, 7 }
  0xf1   : > { %v337_v5 = vpop.permute.xlu0 %336  ;;  %v517_v41 = vsel %vm510_vm4, %v508_v39, %v367_v17 }
  0xf2   : > { %v509_v40 = vsel %vm501_vm3, %v500_v36, %v337_v5  ;;  %v728_v17 = vsub.s32 0, %v1315_v14 }
  0xf4   : > { %v369_v23 = vpop.permute.xlu1 %368 }
  0xf5   : > { %v461_v26 = vpop.permute.xlu0 %460  ;;  %v518_v30 = vsel %vm510_vm4, %v509_v40, %v369_v23 }
  0xf6   : > { %v543_v28 = vsel %vm537_vm7, %v534_v22, %v461_v26 }
  0xf7   : > { %980 = vmatmul.mubr.msk.f32.vlgmr.msra.gmra.mrb[0].mxu1 %vm555_vm8, %v543_v28 }
  0xf8   : > { %v401_v25 = vpop.permute.xlu1 %400 }
  0xf9   : > { %v399_v27 = vpop.permute.xlu0 %398  ;;  %v527_v34 = vsel %vm519_vm5, %v518_v30, %v401_v25 }
  0xfa   : > { %v526_v42 = vsel %vm519_vm5, %v517_v41, %v399_v27 }
  0xfc   : > { %v433_v37 = vpop.permute.xlu1 %432 }
  0xfd   : > { %v431_v38 = vpop.permute.xlu0 %430  ;;  %v536_v43 = vsel %vm528_vm6, %v527_v34, %v433_v37 }
  0xfe   : > { %v535_v44 = vsel %vm528_vm6, %v526_v42, %v431_v38 }
 0x100   : > { %v465_v45 = vpop.permute.xlu1 %464 }
 0x101   : > { %v463_v46 = vpop.permute.xlu0 %462  ;;  %v545_v4 = vsel %vm537_vm7, %v536_v43, %v465_v45 }
 0x102   : > { %v544_v47 = vsel %vm537_vm7, %v535_v44, %v463_v46 }
 0x103   : > { %982 = vmatprep.mubr.msk.f32.mxu1 %vm555_vm8, %v544_v47 }
 0x104   : > { %983 = vmatmul.mubr.msk.f32.gmra.mrb[2].mxu1 %vm555_vm8, %v545_v4 }
 0x189   : > { %v975_v48 = vpop.f32.mrb[0].mxu0 }
 0x18a   : > { %v646_v49 = vpop.f32.mrb[1].mxu0 }
 0x18b   : > { %v685_v50 = vadd.f32 %v975_v48, %v646_v49 }
 0x1a9   : > { %v978_v51 = vpop.f32.mrb[2].mxu0 }
 0x1aa   : > { %v656_v52 = vpop.f32.mrb[3].mxu0 }
 0x1ab   : > { %v686_v54 = vadd.f32 %v685_v50, %v656_v52 }
 0x1ad   : > { %v687_v55 = vadd.f32 %v978_v51, %v686_v54 }
 0x1ca   : > { %v981_v56 = vpop.f32.mrb[0].mxu1 }
 0x1cb   : > { %v666_v58 = vpop.f32.mrb[1].mxu1 }
 0x1cc   : > { %v688_v18 = vadd.f32 %v687_v55, %v666_v58 }
 0x1ce   : > { %v689_v53 = vadd.f32 %v981_v56, %v688_v18 }
 0x1d7   : > { %v984_v57 = vpop.f32.mrb[2].mxu1 }
 0x1d8   : > { %v676_v59 = vpop.f32.mrb[3].mxu1 }
 0x1d9   : > { %v690_v60 = vadd.f32 %v689_v53, %v676_v59 }
 0x1db   : > { %v691_v61 = vadd.f32 %v984_v57, %v690_v60 }
 0x1dd   : > { %v692_v62 = vrot.slane %v691_v61, 4 }
 0x1df   : > { %v693_v63 = vadd.f32 %v692_v62, %v691_v61 }
 0x1e1   : > { %v694_v0 = vrot.slane %v693_v63, 2 }
 0x1e3   : > { %v695_v1 = vadd.f32 %v694_v0, %v693_v63 }
 0x1e5   : > { %v696_v2 = vrot.slane %v695_v1, 1 }
 0x1e7   : > { %v697_v3 = vadd.f32 %v696_v2, %v695_v1 }
 0x1e9   : > { %703 = vrot.lane.b32.xlu1 %v697_v3, %s1046_s19  ;;  %699 = vrot.lane.b32.xlu0 %v697_v3, %s1047_s14 }
 0x1ed   : > { %707 = vrot.lane.b32.xlu0 %v697_v3, %s1042_s18 }
 0x25b   : > { %v700_v6 = vpop.permute.xlu0 %699  ;;  %v704_v8 = vpop.permute.xlu1 %703 }
 0x25c   : > { %v702_v7 = vadd.f32 %v700_v6, %v697_v3 }
 0x25e   : > { %v706_v9 = vadd.f32 %v704_v8, %v702_v7 }
 0x25f   : > { %v708_v10 = vpop.permute.xlu0 %707 }
 0x260   : > { %v710_v11 = vadd.f32 %v708_v10, %v706_v9 }
 0x262   : > { %v711_v12 = vmul.f32 0.00390625, %v710_v11 }
 0x264   : > { %716 = vrot.lane.b32.xlu0 %v711_v12, %s1046_s19  ;;  %713 = vrot.lane.b32.xlu1 %v711_v12, %s1042_s18 }
 0x268   : > { %719 = vrot.lane.b32.xlu1 %v711_v12, %s1047_s14 }
 0x2d6   : > { %v714_v24 = vpop.permute.xlu1 %713  ;;  %v717_v15 = vpop.permute.xlu0 %716 }
 0x2d7   : > { %v722_v16 = vsel %vm501_vm3, %v711_v12, %v714_v24 }
 0x2d8   : > { %v723_v5 = vsel %vm537_vm7, %v722_v16, %v717_v15 }
 0x2da   : > { %v720_v19 = vpop.permute.xlu1 %719 }
 0x2db   : > { %v725_v20 = vsel %vm724_vm9, %v723_v5, %v720_v19 }
 0x2dc   : > { %v729_v21 = vrot.slane %v725_v20, %v728_v17 }
 0x2de   : > { %v730_v22 = vsub.f32 %v646_v49, %v729_v21  ;;  %v731_v23 = vsub.f32 %v975_v48, %v729_v21  ;;  %v732_v26 = vsub.f32 %v656_v52, %v729_v21  ;;  %v733_v28 = vsub.f32 %v978_v51, %v729_v21 }
 0x2df   : > { %v734_v29 = vsub.f32 %v666_v58, %v729_v21  ;;  %v735_v33 = vsub.f32 %v981_v56, %v729_v21  ;;  %v736_v37 = vsub.f32 %v676_v59, %v729_v21  ;;  %v737_v40 = vsub.f32 %v984_v57, %v729_v21 }
 0x2e0   : > { %v738_v25 = vmul.f32 %v730_v22, %v730_v22  ;;  %v739_v27 = vmul.f32 %v731_v23, %v731_v23  ;;  %v740_v31 = vmul.f32 %v732_v26, %v732_v26  ;;  %v741_v35 = vmul.f32 %v733_v28, %v733_v28 }
 0x2e1   : > { %v742_v38 = vmul.f32 %v734_v29, %v734_v29  ;;  %v743_v41 = vmul.f32 %v735_v33, %v735_v33  ;;  %v744_v34 = vmul.f32 %v736_v37, %v736_v37  ;;  %v745_v43 = vmul.f32 %v737_v40, %v737_v40 }
 0x2e2   : > { %v746_v32 = vadd.f32 %v739_v27, %v738_v25 }
 0x2e4   : > { %v747_v36 = vadd.f32 %v746_v32, %v740_v31 }
 0x2e6   : > { %v748_v39 = vadd.f32 %v747_v36, %v741_v35 }
 0x2e8   : > { %v749_v30 = vadd.f32 %v748_v39, %v742_v38 }
 0x2ea   : > { %v750_v42 = vadd.f32 %v749_v30, %v743_v41 }
 0x2ec   : > { %v751_v44 = vadd.f32 %v750_v42, %v744_v34 }
 0x2ee   : > { %v752_v45 = vadd.f32 %v751_v44, %v745_v43 }
 0x2f0   : > { %v753_v46 = vrot.slane %v752_v45, 4 }
 0x2f2   : > { %v754_v4 = vadd.f32 %v753_v46, %v752_v45 }
 0x2f4   : > { %v755_v47 = vrot.slane %v754_v4, 2 }
 0x2f6   : > { %v756_v48 = vadd.f32 %v755_v47, %v754_v4 }
 0x2f8   : > { %v757_v49 = vrot.slane %v756_v48, 1 }
 0x2fa   : > { %v758_v50 = vadd.f32 %v757_v49, %v756_v48 }
 0x2fc   : > { %764 = vrot.lane.b32.xlu1 %v758_v50, %s1046_s19  ;;  %760 = vrot.lane.b32.xlu0 %v758_v50, %s1047_s14 }
 0x300   : > { %768 = vrot.lane.b32.xlu0 %v758_v50, %s1042_s18 }
 0x36e   : > { %v761_v51 = vpop.permute.xlu0 %760  ;;  %v765_v54 = vpop.permute.xlu1 %764 }
 0x36f   : > { %v763_v52 = vadd.f32 %v761_v51, %v758_v50 }
 0x371   : > { %v767_v55 = vadd.f32 %v765_v54, %v763_v52 }
 0x372   : > { %v769_v56 = vpop.permute.xlu0 %768 }
 0x373   : > { %v771_v58 = vadd.f32 %v769_v56, %v767_v55 }
 0x375   : > { %v772_v18 = vmul.f32 0.00390625, %v771_v58 }
 0x377   : > { %v773_v53 = vadd.f32 1e-05, %v772_v18 }
 0x379   : > { %1029 = vrsqrt.f32 %v773_v53 }
 0x383   : > { %v1030_v57 = vpop.eup %1029 }
 0x384   : > { %779 = vrot.lane.b32.xlu0 %v1030_v57, %s1046_s19  ;;  %776 = vrot.lane.b32.xlu1 %v1030_v57, %s1042_s18  ;;  %s143_s18 = scalar_lea.vmem %s1339_s2, %s937_s15 }
 0x388   : > { %782 = vrot.lane.b32.xlu1 %v1030_v57, %s1047_s14 }
 0x3f6   : > { %v777_v59 = vpop.permute.xlu1 %776  ;;  %v780_v60 = vpop.permute.xlu0 %779 }
 0x3f7   : > { %v785_v61 = vsel %vm501_vm3, %v1030_v57, %v777_v59 }
 0x3f8   : > { %v786_v62 = vsel %vm537_vm7, %v785_v61, %v780_v60 }
 0x3fa   : > { %v783_v63 = vpop.permute.xlu1 %782 }
 0x3fb   : > { %v787_v0 = vsel %vm724_vm9, %v786_v62, %v783_v63 }
 0x3fc   : > { %v791_v1 = vrot.slane %v787_v0, %v728_v17 }
 0x3fe   : > { %v792_v2 = vmul.f32 %v791_v1, %v730_v22  ;;  %v793_v3 = vmul.f32 %v791_v1, %v731_v23  ;;  %v794_v6 = vmul.f32 %v791_v1, %v732_v26  ;;  %v795_v7 = vmul.f32 %v791_v1, %v733_v28 }
 0x3ff   : > { %v796_v8 = vmul.f32 %v791_v1, %v734_v29  ;;  %v797_v9 = vmul.f32 %v791_v1, %v735_v33  ;;  %v798_v10 = vmul.f32 %v791_v1, %v736_v37  ;;  %v799_v11 = vmul.f32 %v791_v1, %v737_v40 }
 0x400   : > { %v800_v12 = vmax.f32 %v792_v2, 0.0  ;;  %v801_v13 = vmax.f32 %v793_v3, 0.0  ;;  %v802_v14 = vmax.f32 %v794_v6, 0.0  ;;  %v803_v24 = vmax.f32 %v795_v7, 0.0 }
 0x401   : > { %v804_v15 = vmax.f32 %v796_v8, 0.0  ;;  %v805_v16 = vmax.f32 %v797_v9, 0.0  ;;  %v806_v5 = vmax.f32 %v798_v10, 0.0  ;;  %v807_v17 = vmax.f32 %v799_v11, 0.0 }
 0x402   : > { %808 = vst [vmem:[%s143_s18] sm:$0xff] %v800_v12  ;;  %809 = vst [vmem:[%s143_s18 + $0x8] sm:$0xff] %v801_v13 }
 0x403   : > { %810 = vst [vmem:[%s143_s18 + $0x10] sm:$0xff] %v802_v14  ;;  %811 = vst [vmem:[%s143_s18 + $0x18] sm:$0xff] %v803_v24 }
 0x404   : > { %812 = vst [vmem:[%s143_s18 + $0x20] sm:$0xff] %v804_v15  ;;  %813 = vst [vmem:[%s143_s18 + $0x28] sm:$0xff] %v805_v16 }
 0x405   : > { %814 = vst [vmem:[%s143_s18 + $0x30] sm:$0xff] %v806_v5  ;;  %815 = vst [vmem:[%s143_s18 + $0x38] sm:$0xff] %v807_v17 }
 0x406 PF: > { %s12_s9 = sadd.s32 1, %s1037_s9  }
 0x407   : > { %p9_p4 = scmp.ge.s32.totalorder %s12_s9, 4  }
 0x409   :  { %11 = sbr.rel (!%p9_p4) target bundleno = 1 (0x1), region = 60 }

</bundles_post_ra>
